<compile_context>
chip_gen: v5e
topology: v5e:2x2
jax: 0.10.0
libtpu: 0.0.40
codegen_flags: <defaults>
</compile_context>

<pallas_src>
import jax
import jax.numpy as jnp
from jax.experimental import pallas as pl
from jax.experimental.pallas import tpu as pltpu


def rope_kernel(cos_ref, sin_ref, x_ref, o_ref):
    """One grid step: one (TS, D) sequence slab of one batch element.

    cos_ref : (TS, D/2) f32  -- cos table (half width)
    sin_ref : (TS, D/2) f32  -- sin table (half width)
    x_ref   : (1, TS, D)     -- input embeddings tile
    o_ref   : (1, TS, D)     -- rotated output tile
    """
    half = cos_ref.shape[-1]
    x = x_ref[0].astype(jnp.float32)          # (TS, D), single full-width load
    x1 = x[:, :half]                          # 256-lane aligned slices -> no relayout
    x2 = x[:, half:]
    c = cos_ref[...]
    s = sin_ref[...]
    # rotate_half(x) = cat(-x2, x1); folded into the two half outputs below.
    o_ref[0, :, :half] = (x1 * c - x2 * s).astype(o_ref.dtype)
    o_ref[0, :, half:] = (x2 * c + x1 * s).astype(o_ref.dtype)


def _choose_seq_tile(S, target=1024):
    """Sequence tile: full S if small, else a clean divisor (multiple of 8),
    else a capped multiple of 8 (grid uses cdiv, last block is partial)."""
    if S <= target:
        return S
    for ts in range(target, 7, -1):
        if S % ts == 0 and ts % 8 == 0:
            return ts
    return max((target // 8) * 8, 8)


def rotary_positional_encoding(x, inv_freq):
    """x: (B, S, D), inv_freq: (D//2,) f32  ->  (B, S, D), same dtype as x."""
    B, S, D = x.shape
    assert D % 2 == 0, "embed_dim must be even for RoPE"
    half = D // 2

    # Precompute half-width cos/sin tables once (no EUP work in the kernel).
    pos = jnp.arange(S, dtype=jnp.float32)[:, None]                   # (S, 1)
    freqs = pos * inv_freq.astype(jnp.float32)[None, :]               # (S, D/2)
    cos_h = jnp.cos(freqs)                                            # (S, D/2)
    sin_h = jnp.sin(freqs)                                            # (S, D/2)

    TS = _choose_seq_tile(S)
    n_s = pl.cdiv(S, TS)
    # Sequence-tile axis OUTER, batch axis INNER: the table block index is
    # unchanged across consecutive (inner) batch steps, so the table DMA is
    # elided and amortized over B.
    grid = (n_s, B)

    return pl.pallas_call(
        rope_kernel,
        out_shape=jax.ShapeDtypeStruct((B, S, D), x.dtype),
        grid_spec=pltpu.PrefetchScalarGridSpec(
            num_scalar_prefetch=0,
            grid=grid,
            in_specs=[
                # Tables: independent of the (inner) batch axis -> DMA elided
                # until the sequence-tile index changes.
                pl.BlockSpec((TS, half), lambda s, b: (s, 0)),
                pl.BlockSpec((TS, half), lambda s, b: (s, 0)),
                pl.BlockSpec((1, TS, D), lambda s, b: (b, s, 0)),
            ],
            out_specs=pl.BlockSpec((1, TS, D), lambda s, b: (b, s, 0)),
        ),
        compiler_params=pltpu.CompilerParams(
            # Both grid axes are independent -> shardable across TensorCores.
            dimension_semantics=("parallel", "parallel"),
            # 48 MiB: above v5e's 16 MiB default (needed for TS=1024 f32
            # blocks), below v7x's 64 MiB physical VMEM.
            vmem_limit_bytes=48 * 1024 * 1024,
        ),
    )(cos_h, sin_h, x)


def rope_reference(x, inv_freq):
    """Pure-JAX reference mirroring the PyTorch forward."""
    B, S, D = x.shape
    positions = jnp.arange(S, dtype=jnp.float32)[:, None]            # (S, 1)
    freqs = positions * inv_freq[None, :]                            # (S, D/2)
    emb = jnp.concatenate((freqs, freqs), axis=-1)                   # (S, D)
    cos_emb = jnp.cos(emb)[None]                                     # (1, S, D)
    sin_emb = jnp.sin(emb)[None]
    x1, x2 = jnp.split(x, 2, axis=-1)
    rot = jnp.concatenate((-x2, x1), axis=-1)
    return x * cos_emb + rot * sin_emb


if __name__ == "__main__":
    # Small shapes consistent with the module (embed_dim=512, seq_len=128).
    batch, seq_len, embed_dim = 2, 128, 512

    key = jax.random.PRNGKey(0)
    x = jax.random.normal(key, (batch, seq_len, embed_dim), dtype=jnp.float32)

    # Deterministic buffer init, exactly as the module's __init__:
    inv_freq = 1.0 / (10000.0 ** (
        jnp.arange(0, embed_dim, 2, dtype=jnp.float32) / embed_dim))

    out = rotary_positional_encoding(x, inv_freq)
    out = jax.block_until_ready(out)

    ref = rope_reference(x, inv_freq)
    assert out.shape == (batch, seq_len, embed_dim)
    assert jnp.allclose(out, ref, atol=1e-5, rtol=1e-5)

    print("KERNEL_OK")
</pallas_src>

<mosaic_0001>
module attributes {stable_mosaic.version = 11 : i64} {
  func.func @rope_kernel(%arg0: i32, %arg1: i32, %arg2: memref<128x256xf32, #tpu.memory_space<vmem>>, %arg3: memref<128x256xf32, #tpu.memory_space<vmem>>, %arg4: memref<1x128x512xf32, #tpu.memory_space<vmem>>, %arg5: memref<1x128x512xf32, #tpu.memory_space<vmem>>) attributes {dimension_semantics = [#tpu.dimension_semantics<parallel>, #tpu.dimension_semantics<parallel>], iteration_bounds = array<i64: 1, 2>, scalar_prefetch = 0 : i64, scratch_operands = 0 : i64, tpu.core_type = #tpu.core_type<tc>, window_params = [{transform_indices = @transform_0, window_bounds = array<i64: 128, 256>}, {transform_indices = @transform_1, window_bounds = array<i64: 128, 256>}, {transform_indices = @transform_2, window_bounds = array<i64: 1, 128, 512>}, {transform_indices = @transform_3, window_bounds = array<i64: 1, 128, 512>}]} {
    %c0 = arith.constant 0 : index
    %c0_0 = arith.constant 0 : index
    %c0_1 = arith.constant 0 : index
    %0 = vector.load %arg4[%c0, %c0_0, %c0_1] : memref<1x128x512xf32, #tpu.memory_space<vmem>>, vector<1x128x512xf32>
    %1 = vector.shape_cast %0 : vector<1x128x512xf32> to vector<128x512xf32>
    %2 = vector.extract_strided_slice %1 {offsets = [0, 0], sizes = [128, 256], strides = [1, 1]} : vector<128x512xf32> to vector<128x256xf32>
    %3 = vector.extract_strided_slice %1 {offsets = [0, 256], sizes = [128, 256], strides = [1, 1]} : vector<128x512xf32> to vector<128x256xf32>
    %c0_2 = arith.constant 0 : index
    %c0_3 = arith.constant 0 : index
    %4 = vector.load %arg2[%c0_2, %c0_3] : memref<128x256xf32, #tpu.memory_space<vmem>>, vector<128x256xf32>
    %c0_4 = arith.constant 0 : index
    %c0_5 = arith.constant 0 : index
    %5 = vector.load %arg3[%c0_4, %c0_5] : memref<128x256xf32, #tpu.memory_space<vmem>>, vector<128x256xf32>
    %6 = arith.mulf %2, %4 : vector<128x256xf32>
    %7 = arith.mulf %3, %5 : vector<128x256xf32>
    %8 = arith.subf %6, %7 : vector<128x256xf32>
    %c0_6 = arith.constant 0 : index
    %c0_7 = arith.constant 0 : index
    %c0_8 = arith.constant 0 : index
    %9 = vector.load %arg5[%c0_6, %c0_7, %c0_8] : memref<1x128x512xf32, #tpu.memory_space<vmem>>, vector<1x128x256xf32>
    %10 = vector.shape_cast %9 : vector<1x128x256xf32> to vector<128x256xf32>
    %11 = vector.shape_cast %8 : vector<128x256xf32> to vector<1x128x256xf32>
    tpu.vector_store %arg5[%c0_6, %c0_7, %c0_8], %11 {strides = array<i32>} : memref<1x128x512xf32, #tpu.memory_space<vmem>>, vector<1x128x256xf32>,
    %12 = arith.mulf %3, %4 : vector<128x256xf32>
    %13 = arith.mulf %2, %5 : vector<128x256xf32>
    %14 = arith.addf %12, %13 : vector<128x256xf32>
    %c0_9 = arith.constant 0 : index
    %c0_10 = arith.constant 0 : index
    %c256 = arith.constant 256 : index
    %15 = vector.load %arg5[%c0_9, %c0_10, %c256] : memref<1x128x512xf32, #tpu.memory_space<vmem>>, vector<1x128x256xf32>
    %16 = vector.shape_cast %15 : vector<1x128x256xf32> to vector<128x256xf32>
    %17 = vector.shape_cast %14 : vector<128x256xf32> to vector<1x128x256xf32>
    tpu.vector_store %arg5[%c0_9, %c0_10, %c256], %17 {strides = array<i32>} : memref<1x128x512xf32, #tpu.memory_space<vmem>>, vector<1x128x256xf32>,
    return
  }
  func.func @transform_0(%arg0: i32, %arg1: i32) -> (i32, i32) {
    %c0_i32 = arith.constant 0 : i32
    %c0_i32_0 = arith.constant 0 : i32
    return %arg0, %c0_i32 : i32, i32
  }
  func.func @transform_1(%arg0: i32, %arg1: i32) -> (i32, i32) {
    %c0_i32 = arith.constant 0 : i32
    %c0_i32_0 = arith.constant 0 : i32
    return %arg0, %c0_i32 : i32, i32
  }
  func.func @transform_2(%arg0: i32, %arg1: i32) -> (i32, i32, i32) {
    %c0_i32 = arith.constant 0 : i32
    %c0_i32_0 = arith.constant 0 : i32
    return %arg1, %arg0, %c0_i32 : i32, i32, i32
  }
  func.func @transform_3(%arg0: i32, %arg1: i32) -> (i32, i32, i32) {
    %c0_i32 = arith.constant 0 : i32
    %c0_i32_0 = arith.constant 0 : i32
    return %arg1, %arg0, %c0_i32 : i32, i32, i32
  }
}

</mosaic_0001>

<bundles_post_ra>
// kernel: tpu_custom_call.1
= control target key start
LH: loop header
LB: loop body
LE: loop exit
PB: predicated region body
PF: predicated region fallthrough
CT: control target
= control target key end

     0   :  { %s1892_s0 = inlined_call_operand.hbm [shape: f32[128,256], index: 0, kind: input, shape index: {}]   ;;  %s1893_s1 = inlined_call_operand.hbm [shape: f32[128,256], index: 1, kind: input, shape index: {}]   ;;  %s1894_s2 = inlined_call_operand.hbm [shape: f32[2,128,512], index: 2, kind: input, shape index: {}]   ;;  %s1895_s3 = inlined_call_operand.hbm [shape: f32[2,128,512], index: 3, kind: output, shape index: {}]  }
   0x1   :  { %1938 = sst [smem:[#allocation55_spill]] %s1892_s0 }
   0x2   :  { %8 = vsyncpa [#allocation3], 0 }
   0x3   :  { %9 = vsyncpa [#allocation6], 0 }
   0x4   :  { %10 = vsyncpa [#allocation4], 0 }
   0x5   :  { %12 = vsyncpa [#allocation4 + $0x1], 0  ;;  %s1096_s12 = smov 0   ;;  %s1098_s13 = smov 0  }
   0x6   :  { %s1100_s14 = smov 0   ;;  %s1102_s15 = smov 0  }
   0x7   :  { %s1104_s16 = smov 0   ;;  %s1106_s17 = smov 0  }
   0x8 LB: > { %s1127_s18 = sadd.s32 4294967295, %s1066_s17   ;;  %s777_s19 = sadd.s32 4294967294, %s1066_s17   ;;  %s1066_s17 = sphi %s1106_s17, %s18_s17   ;;  %s1062_s16 = sphi %s1104_s16, %s2033_s16   ;;  %s1058_s15 = sphi %s1102_s15, %s2032_s15   ;;  %s1054_s14 = sphi %s1100_s14, %s2031_s14   ;;  %s1050_s13 = sphi %s1098_s13, %s2030_s13   ;;  %s1046_s12 = sphi %s1096_s12, %s2029_s12  }
   0x9   : > { %p104_p0 = scmp.ne.s32.totalorder %s1050_s13, %s1046_s12  ;;  %p105_p1 = scmp.eq.s32.totalorder %s1127_s18, 0 }
   0xa   : > { %p130_p2 = scmp.eq.s32.totalorder %s1127_s18, 1  ;;  %p136_p3 = scmp.eq.s32.totalorder %s777_s19, 1 }
   0xb   : > { %p1136_p4 = por %p105_p1, %p104_p0  ;;  %p778_p5 = scmp.ge.s32.totalorder %s1066_s17, 1 }
   0xc   : > { %p1141_p6 = por %p136_p3, %p104_p0  ;;  %p143_p7 = scmp.lt.s32.totalorder %s1066_s17, 3 }
   0xd   : > { %s1941_s0 = sld [smem:[#allocation55_spill]]  ;;  %s1068_s26 = smov [#allocation2]  }
   0xe   : > { %p1149_p8 = pnand %p778_p5, %p143_p7  ;;  %s160_s27 = sshll.u32 %s1068_s26, 4  ;;  %s161_s27 = int_to_ptr.vmem [resolvable:$true] %s160_s27 }
   0xf   : > { %p781_p11 = scmp.ge.s32.totalorder %s1066_s17, 2  ;;  %s176_s30 = sshll.u32 %s1893_s1, 4  ;;  %s177_s30 = int_to_ptr.hbm [resolvable:$true] %s176_s30 }
  0x10   : > { %p809_p9 = pneg %p1149_p8  ;;  %s1069_s4 = smov 256  }
  0x11   : > { %s1070_s5 = smov 16   ;;  %s1071_s6 = smov [#allocation5]  }
  0x12   : > { %p810_p10 = pnand %p809_p9, %p105_p1  ;;  %s178_s7 = sshll.u32 %s1071_s6, 4  ;;  %s179_s7 = int_to_ptr.vmem [resolvable:$true] %s178_s7 }
  0x13   : > { %s158_s24 = sshll.u32 %s1941_s0, 4  ;;  %s27_s8 = sadd.s32 1, %s1062_s16  ;;  %s159_s24 = int_to_ptr.hbm [resolvable:$true] %s158_s24 }
  0x14   : > { %812 = dma.hbm_to_vmem [thread:$0]  (!%p810_p10), %s159_s24, 4096, %s161_s27, [#allocation3], %s1069_s4, %s1069_s4, %s1070_s5  }
  0x15   : > { %815 = dma.hbm_to_vmem [thread:$0]  (!%p810_p10), %s177_s30, 4096, %s179_s7, [#allocation6], %s1069_s4, %s1069_s4, %s1070_s5  }
  0x16   : > { %s91_s9 = sadd.s32 1, %s1054_s14  ;;  %p28_p12 = scmp.ge.s32.totalorder %s27_s8, 2 }
  0x17   : > { %p98_p13 = scmp.ne.s32.totalorder %s1054_s14, %s1050_s13  ;;  %p99_p0 = scmp.eq.s32.totalorder %s1066_s17, 0 }
  0x18   : > { %p826_p3 = scmp.lt.s32.totalorder %s1066_s17, 2  ;;  %s2035_s8 = smov (%p28_p12, %s27_s8), 0 }
  0x19   : > { %p1169_p5 = por %p99_p0, %p98_p13  ;;  %p1175_p7 = por %p130_p2, %p98_p13 }
  0x1a   : > { %s86_s19 = ssub.s32 %s1062_s16, %s2035_s8  ;;  %s192_s22 = sand.u32 1, %s1066_s17  }
  0x1b   : > { %p89_p9 = scmp.eq.s32.totalorder %s86_s19, 0  ;;  %s194_s23 = sand.u32 1, %s1054_s14  }
  0x1c   : > { %s795_s24 = sshll.u32 %s1062_s16, 9  ;;  %s782_s27 = sshll.u32 %s194_s23, 9 }
  0x1d   : > { %s1185_s26 = scalar_select %p89_p9, %s1054_s14, %s91_s9  }
  0x1e   : > { %s204_s30 = scalar_lea.hbm %s1894_s2, %s795_s24  ;;  %s196_s5 = scalar_lea.vmem [#allocation7], %s782_s27 }
  0x1f   : > { %s205_s4 = sshll.u32 %s204_s30, 4  ;;  %s207_s6 = sshll.u32 %s196_s5, 4  ;;  %s206_s4 = int_to_ptr.hbm [resolvable:$true] %s205_s4  ;;  %s208_s6 = int_to_ptr.vmem [resolvable:$true] %s207_s6 }
  0x20   : > { %p817_p2 = pnand %p826_p3, %p1169_p5  ;;  %s193_s7 = scalar_lea.sflag [#allocation3], %s192_s22 }
  0x21   : > { %s1072_s0 = smov 512   ;;  %s1073_s19 = smov 32  }
  0x22   : > { %819 = dma.hbm_to_vmem [thread:$0]  (!%p817_p2), %s206_s4, 8192, %s208_s6, %s193_s7, %s1072_s0, %s1072_s0, %s1073_s19  }
  0x23   : > { %219 = sbr.rel (%p1149_p8) target bundleno = 164 (0xa4), region = 32 }
  0x28   : > { %1029 = dma.done.wait (%p105_p1), [#allocation3], 4096  }
  0x29   : > { %1031 = vsyncadd (%p105_p1), [#allocation3], 4294963200 }
  0x2a   : > { %1033 = dma.done.wait (%p105_p1), [#allocation6], 4096  }
  0x2b   : > { %1035 = vsyncadd (%p105_p1), [#allocation6], 4294963200  ;;  %s231_s0 = sand.u32 1, %s1127_s18   ;;  %s233_s9 = sand.u32 1, %s1050_s13  }
  0x2c   : > { %s1208_s25 = sshll.u32 %s233_s9, 9  ;;  %s232_s10 = scalar_lea.sflag [#allocation3], %s231_s0 }
  0x2d   : > { %s1211_s22 = scalar_lea.vmem [#allocation7], %s1208_s25 }
  0x2e   : > { %1037 = dma.done.wait (%p1136_p4), %s232_s10, 8192  }
  0x2f   : > { %1039 = vsyncadd (%p1136_p4), %s232_s10, 4294959104  ;;  %v1218_v0 = vld [vmem:[%s1211_s22] sm:$0xff]  ;;  %v1221_v1 = vld [vmem:[%s1211_s22 + $0x10] sm:$0xff]  ;;  %s1272_s18 = scalar_lea.vmem [#allocation8], %s1208_s25  ;;  %s796_s20 = sshll.u32 %s1058_s15, 9 }
  0x30   : > { %v327_v2 = vld [vmem:[#allocation2] sm:$0xff]  ;;  %v1225_v5 = vld [vmem:[%s1211_s22 + $0x8] sm:$0xff]  ;;  %v1228_v6 = vld [vmem:[%s1211_s22 + $0x18] sm:$0xff]  ;;  %s662_s24 = scalar_lea.hbm %s1895_s3, %s796_s20  ;;  %s663_s27 = sshll.u32 %s1272_s18, 4  ;;  %s664_s27 = int_to_ptr.vmem [resolvable:$true] %s663_s27 }
  0x31   : > { %v359_v3 = vld [vmem:[#allocation5] sm:$0xff]  ;;  %v391_v4 = vmul.f32 %v327_v2, %v1218_v0  ;;  %v1231_v8 = vld [vmem:[#allocation2 + $0x8] sm:$0xff]  ;;  %v1243_v13 = vld [vmem:[%s1211_s22 + $0x30] sm:$0xff]  ;;  %v519_v58 = vmul.f32 %v327_v2, %v1221_v1  ;;  %s665_s28 = sshll.u32 %s662_s24, 4  ;;  %s648_s29 = scalar_lea.sflag [#allocation4], %s233_s9  ;;  %s666_s28 = int_to_ptr.hbm [resolvable:$true] %s665_s28 }
  0x32   : > { %v423_v7 = vmul.f32 %v359_v3, %v1221_v1  ;;  %v1233_v9 = vld [vmem:[#allocation5 + $0x8] sm:$0xff]  ;;  %v1236_v10 = vld [vmem:[%s1211_s22 + $0x20] sm:$0xff]  ;;  %v392_v11 = vmul.f32 %v1231_v8, %v1225_v5  ;;  %v1245_v14 = vld [vmem:[#allocation2 + $0x10] sm:$0xff]  ;;  %v551_v59 = vmul.f32 %v359_v3, %v1218_v0  ;;  %v520_v0 = vmul.f32 %v1231_v8, %v1228_v6  ;;  %s990_s30 = sshra.s32 %s666_s28, 4  ;;  %s996_s7 = scalar_lea.hbm %s1895_s3, 1024  ;;  %s991_s30 = int_to_ptr.hbm [resolvable:$true] %s990_s30 }
  0x33   : > { %v424_v12 = vmul.f32 %v1233_v9, %v1228_v6  ;;  %v1247_v15 = vld [vmem:[#allocation5 + $0x10] sm:$0xff]  ;;  %v393_v17 = vmul.f32 %v1245_v14, %v1236_v10  ;;  %v1254_v19 = vld [vmem:[%s1211_s22 + $0x28] sm:$0xff]  ;;  %v1257_v20 = vld [vmem:[%s1211_s22 + $0x38] sm:$0xff]  ;;  %s992_s4 = scalar_lea.hbm %s991_s30, 512  ;;  %p997_p10 = scmp.lt.s32.totalorder %s991_s30, %s1895_s3 }
  0x34   : > { %v455_v16 = vsub.f32 %v391_v4, %v423_v7  ;;  %v425_v18 = vmul.f32 %v1247_v15, %v1243_v13  ;;  %v1259_v21 = vld [vmem:[#allocation2 + $0x18] sm:$0xff]  ;;  %v1266_v25 = vld [vmem:[%s1211_s22 + $0x40] sm:$0xff]  ;;  %v1269_v26 = vld [vmem:[%s1211_s22 + $0x50] sm:$0xff]  ;;  %p993_p1 = scmp.ne.s32.totalorder %s991_s30, %s992_s4  ;;  %p998_p12 = scmp.lt.s32.totalorder %s996_s7, %s992_s4 }
  0x35   : > { %v456_v22 = vsub.f32 %v392_v11, %v424_v12  ;;  %v1261_v23 = vld [vmem:[#allocation5 + $0x18] sm:$0xff]  ;;  %v394_v24 = vmul.f32 %v1259_v21, %v1254_v19  ;;  %v1277_v29 = vld [vmem:[#allocation2 + $0x20] sm:$0xff]  ;;  %v1282_v31 = vld [vmem:[%s1211_s22 + $0x48] sm:$0xff] }
  0x36   : > { %487 = vst [vmem:[%s1272_s18] sm:$0xff] %v455_v16  ;;  %v457_v27 = vsub.f32 %v393_v17, %v425_v18  ;;  %v426_v28 = vmul.f32 %v1261_v23, %v1257_v20  ;;  %v1279_v30 = vld [vmem:[#allocation5 + $0x20] sm:$0xff]  ;;  %v395_v32 = vmul.f32 %v1277_v29, %v1266_v25  ;;  %v1290_v34 = vld [vmem:[%s1211_s22 + $0x58] sm:$0xff]  ;;  %v1292_v35 = vld [vmem:[#allocation2 + $0x28] sm:$0xff]  ;;  %v583_v16 = vadd.f32 %v551_v59, %v519_v58  ;;  %p994_p4 = pnand %p993_p1, %p1175_p7  ;;  %p999_p13 = por %p998_p12, %p997_p10 }
  0x37   : > { %488 = vst [vmem:[%s1272_s18 + $0x8] sm:$0xff] %v456_v22  ;;  %v427_v33 = vmul.f32 %v1279_v30, %v1269_v26  ;;  %v1294_v36 = vld [vmem:[#allocation5 + $0x28] sm:$0xff]  ;;  %v396_v38 = vmul.f32 %v1292_v35, %v1282_v31  ;;  %v1302_v40 = vld [vmem:[%s1211_s22 + $0x60] sm:$0xff]  ;;  %v1305_v41 = vld [vmem:[%s1211_s22 + $0x70] sm:$0xff]  ;;  %v552_v17 = vmul.f32 %v1233_v9, %v1225_v5 }
  0x38   : > { %489 = vst [vmem:[%s1272_s18 + $0x20] sm:$0xff] %v457_v27  ;;  %v458_v37 = vsub.f32 %v394_v24, %v426_v28  ;;  %v428_v39 = vmul.f32 %v1294_v36, %v1290_v34  ;;  %v1307_v42 = vld [vmem:[#allocation2 + $0x30] sm:$0xff]  ;;  %v1314_v46 = vld [vmem:[%s1211_s22 + $0x68] sm:$0xff]  ;;  %v1317_v47 = vld [vmem:[%s1211_s22 + $0x78] sm:$0xff]  ;;  %p995_p8 = pneg %p994_p4 }
  0x39   : > { %v459_v43 = vsub.f32 %v395_v32, %v427_v33  ;;  %v1309_v44 = vld [vmem:[#allocation5 + $0x30] sm:$0xff]  ;;  %v397_v45 = vmul.f32 %v1307_v42, %v1302_v40  ;;  %v1322_v50 = vld [vmem:[#allocation2 + $0x38] sm:$0xff]  ;;  %v1327_v52 = vld [vmem:[%s1211_s22 + $0x80] sm:$0xff]  ;;  %615 = vst [vmem:[%s1272_s18 + $0x10] sm:$0xff] %v583_v16 }
  0x3a   : > { %490 = vst [vmem:[%s1272_s18 + $0x28] sm:$0xff] %v458_v37  ;;  %v460_v48 = vsub.f32 %v396_v38, %v428_v39  ;;  %v429_v49 = vmul.f32 %v1309_v44, %v1305_v41  ;;  %v1324_v51 = vld [vmem:[#allocation5 + $0x38] sm:$0xff]  ;;  %v398_v53 = vmul.f32 %v1322_v50, %v1314_v46  ;;  %v1335_v55 = vld [vmem:[%s1211_s22 + $0x90] sm:$0xff]  ;;  %v1337_v56 = vld [vmem:[#allocation2 + $0x40] sm:$0xff]  ;;  %p1000_p0 = pnand %p999_p13, %p995_p8 }
  0x3b   : > { %491 = vst [vmem:[%s1272_s18 + $0x40] sm:$0xff] %v459_v43  ;;  %v430_v54 = vmul.f32 %v1324_v51, %v1317_v47  ;;  %v1339_v57 = vld [vmem:[#allocation5 + $0x40] sm:$0xff]  ;;  %v399_v61 = vmul.f32 %v1337_v56, %v1327_v52  ;;  %v1349_v63 = vld [vmem:[%s1211_s22 + $0x88] sm:$0xff]  ;;  %v1352_v4 = vld [vmem:[%s1211_s22 + $0x98] sm:$0xff] }
  0x3c   : > { %492 = vst [vmem:[%s1272_s18 + $0x48] sm:$0xff] %v460_v48  ;;  %v461_v60 = vsub.f32 %v397_v45, %v429_v49  ;;  %v431_v62 = vmul.f32 %v1339_v57, %v1335_v55  ;;  %v1354_v7 = vld [vmem:[#allocation2 + $0x48] sm:$0xff]  ;;  %v1363_v11 = vld [vmem:[%s1211_s22 + $0xa0] sm:$0xff]  ;;  %v1366_v12 = vld [vmem:[%s1211_s22 + $0xb0] sm:$0xff]  ;;  %v521_v48 = vmul.f32 %v1245_v14, %v1243_v13 }
  0x3d   : > { %v462_v1 = vsub.f32 %v398_v53, %v430_v54  ;;  %v1358_v2 = vld [vmem:[#allocation5 + $0x48] sm:$0xff]  ;;  %v400_v3 = vmul.f32 %v1354_v7, %v1349_v63  ;;  %v1373_v8 = vld [vmem:[#allocation2 + $0x50] sm:$0xff]  ;;  %v1386_v9 = vld [vmem:[%s1211_s22 + $0xb8] sm:$0xff] }
  0x3e   : > { %493 = vst [vmem:[%s1272_s18 + $0x60] sm:$0xff] %v461_v60  ;;  %v463_v18 = vsub.f32 %v399_v61, %v431_v62  ;;  %v432_v6 = vmul.f32 %v1358_v2, %v1352_v4  ;;  %v1375_v22 = vld [vmem:[#allocation5 + $0x50] sm:$0xff]  ;;  %v1378_v24 = vld [vmem:[%s1211_s22 + $0xa8] sm:$0xff]  ;;  %v401_v27 = vmul.f32 %v1373_v8, %v1363_v11  ;;  %v1388_v28 = vld [vmem:[#allocation2 + $0x58] sm:$0xff]  ;;  %v584_v60 = vadd.f32 %v552_v17, %v520_v0 }
  0x3f   : > { %494 = vst [vmem:[%s1272_s18 + $0x68] sm:$0xff] %v462_v1  ;;  %v433_v5 = vmul.f32 %v1375_v22, %v1366_v12  ;;  %v1390_v32 = vld [vmem:[#allocation5 + $0x58] sm:$0xff]  ;;  %v402_v37 = vmul.f32 %v1388_v28, %v1378_v24  ;;  %v1398_v39 = vld [vmem:[%s1211_s22 + $0xc0] sm:$0xff]  ;;  %v1401_v43 = vld [vmem:[%s1211_s22 + $0xd0] sm:$0xff]  ;;  %v553_v61 = vmul.f32 %v1247_v15, %v1236_v10 }
  0x40   : > { %495 = vst [vmem:[%s1272_s18 + $0x80] sm:$0xff] %v463_v18  ;;  %v464_v33 = vsub.f32 %v400_v3, %v432_v6  ;;  %v434_v38 = vmul.f32 %v1390_v32, %v1386_v9  ;;  %v1403_v45 = vld [vmem:[#allocation2 + $0x60] sm:$0xff]  ;;  %v1412_v58 = vld [vmem:[%s1211_s22 + $0xc8] sm:$0xff]  ;;  %v1415_v59 = vld [vmem:[%s1211_s22 + $0xd8] sm:$0xff] }
  0x41   : > { %v465_v49 = vsub.f32 %v401_v27, %v433_v5  ;;  %v1407_v53 = vld [vmem:[#allocation5 + $0x60] sm:$0xff]  ;;  %v403_v54 = vmul.f32 %v1403_v45, %v1398_v39  ;;  %v1423_v62 = vld [vmem:[#allocation2 + $0x68] sm:$0xff]  ;;  %v1436_v15 = vld [vmem:[%s1211_s22 + $0xf0] sm:$0xff]  ;;  %616 = vst [vmem:[%s1272_s18 + $0x18] sm:$0xff] %v584_v60 }
  0x42   : > { %496 = vst [vmem:[%s1272_s18 + $0x88] sm:$0xff] %v464_v33  ;;  %v466_v13 = vsub.f32 %v402_v37, %v434_v38  ;;  %v435_v14 = vmul.f32 %v1407_v53, %v1401_v43  ;;  %v1425_v1 = vld [vmem:[#allocation5 + $0x68] sm:$0xff]  ;;  %v1428_v3 = vld [vmem:[%s1211_s22 + $0xe0] sm:$0xff]  ;;  %v404_v0 = vmul.f32 %v1423_v62, %v1412_v58  ;;  %v1438_v16 = vld [vmem:[#allocation2 + $0x70] sm:$0xff]  ;;  %v522_v38 = vmul.f32 %v1259_v21, %v1257_v20 }
  0x43   : > { %1945 = vst [vmem:[#allocation13_spill] sm:$0xff] %v1428_v3  ;;  %v436_v10 = vmul.f32 %v1425_v1, %v1415_v59  ;;  %v1440_v17 = vld [vmem:[#allocation5 + $0x70] sm:$0xff]  ;;  %v405_v6 = vmul.f32 %v1438_v16, %v1428_v3  ;;  %v1448_v5 = vld [vmem:[%s1211_s22 + $0xe8] sm:$0xff]  ;;  %v1451_v33 = vld [vmem:[%s1211_s22 + $0xf8] sm:$0xff]  ;;  %v585_v3 = vadd.f32 %v553_v61, %v521_v48 }
  0x44   : > { %497 = vst [vmem:[%s1272_s18 + $0xa0] sm:$0xff] %v465_v49  ;;  %v467_v18 = vsub.f32 %v403_v54, %v435_v14  ;;  %v437_v27 = vmul.f32 %v1440_v17, %v1436_v15  ;;  %v1453_v37 = vld [vmem:[#allocation2 + $0x78] sm:$0xff]  ;;  %v1462_v14 = vld [vmem:[%s1211_s22 + $0x100] sm:$0xff]  ;;  %v1488_v60 = vld [vmem:[#allocation2 + $0x88] sm:$0xff] }
  0x45   : > { %1946 = vst [vmem:[#allocation14_spill] sm:$0xff] %v1438_v16  ;;  %v468_v49 = vsub.f32 %v404_v0, %v436_v10  ;;  %v406_v54 = vmul.f32 %v1453_v37, %v1448_v5  ;;  %v554_v16 = vmul.f32 %v1261_v23, %v1254_v19  ;;  %v1473_v0 = vld [vmem:[#allocation2 + $0x80] sm:$0xff]  ;;  %v1486_v23 = vld [vmem:[%s1211_s22 + $0x118] sm:$0xff]  ;;  %v1490_v61 = vld [vmem:[#allocation5 + $0x88] sm:$0xff] }
  0x46   : > { %1947 = vst [vmem:[#allocation15_spill] sm:$0xff] %v1440_v17  ;;  %v1465_v17 = vld [vmem:[%s1211_s22 + $0x110] sm:$0xff]  ;;  %v469_v20 = vsub.f32 %v405_v6, %v437_v27  ;;  %v1475_v10 = vld [vmem:[#allocation5 + $0x80] sm:$0xff]  ;;  %v407_v48 = vmul.f32 %v1473_v0, %v1462_v14  ;;  %v440_v27 = vmul.f32 %v1490_v61, %v1486_v23 }
  0x47   : > { %498 = vst [vmem:[%s1272_s18 + $0xa8] sm:$0xff] %v466_v13  ;;  %v1457_v13 = vld [vmem:[#allocation5 + $0x78] sm:$0xff]  ;;  %v439_v19 = vmul.f32 %v1475_v10, %v1465_v17 }
  0x48   : > { %1948 = vst [vmem:[#allocation16_spill] sm:$0xff] %v1448_v5  ;;  %v438_v21 = vmul.f32 %v1457_v13, %v1451_v33  ;;  %v1478_v5 = vld [vmem:[%s1211_s22 + $0x108] sm:$0xff] }
  0x49   : > { %1949 = vst [vmem:[#allocation17_spill] sm:$0xff] %v1462_v14  ;;  %v408_v6 = vmul.f32 %v1488_v60, %v1478_v5  ;;  %v1503_v14 = vld [vmem:[#allocation2 + $0x90] sm:$0xff] }
  0x4a   : > { %1950 = vst [vmem:[#allocation18_spill] sm:$0xff] %v1465_v17  ;;  %v1507_v17 = vld [vmem:[#allocation5 + $0x90] sm:$0xff] }
  0x4b   : > { %499 = vst [vmem:[%s1272_s18 + $0xc0] sm:$0xff] %v467_v18  ;;  %v470_v18 = vsub.f32 %v406_v54, %v438_v21  ;;  %v1512_v21 = vld [vmem:[%s1211_s22 + $0x128] sm:$0xff] }
  0x4c   : > { %1951 = vst [vmem:[#allocation19_spill] sm:$0xff] %v1473_v0  ;;  %v523_v0 = vmul.f32 %v1277_v29, %v1269_v26  ;;  %v1523_v29 = vld [vmem:[#allocation2 + $0x98] sm:$0xff] }
  0x4d   : > { %1952 = vst [vmem:[#allocation20_spill] sm:$0xff] %v1475_v10  ;;  %v1501_v10 = vld [vmem:[%s1211_s22 + $0x130] sm:$0xff] }
  0x4e   : > { %1953 = vst [vmem:[#allocation21_spill] sm:$0xff] %v1478_v5  ;;  %v586_v5 = vadd.f32 %v554_v16, %v522_v38  ;;  %v441_v26 = vmul.f32 %v1507_v17, %v1501_v10  ;;  %v1538_v16 = vld [vmem:[#allocation2 + $0xa0] sm:$0xff] }
  0x4f   : > { %500 = vst [vmem:[%s1272_s18 + $0xc8] sm:$0xff] %v468_v49  ;;  %v1498_v49 = vld [vmem:[%s1211_s22 + $0x120] sm:$0xff] }
  0x50   : > { %1954 = vst [vmem:[#allocation22_spill] sm:$0xff] %v1486_v23  ;;  %v409_v54 = vmul.f32 %v1503_v14, %v1498_v49  ;;  %v472_v23 = vsub.f32 %v408_v6, %v440_v27  ;;  %v1540_v38 = vld [vmem:[#allocation5 + $0xa0] sm:$0xff] }
  0x51   : > { %1955 = vst [vmem:[#allocation23_spill] sm:$0xff] %v1488_v60  ;;  %v555_v60 = vmul.f32 %v1279_v30, %v1266_v25  ;;  %v1536_v30 = vld [vmem:[%s1211_s22 + $0x150] sm:$0xff] }
  0x52   : > { %1956 = vst [vmem:[#allocation24_spill] sm:$0xff] %v1490_v61  ;;  %v1515_v61 = vld [vmem:[%s1211_s22 + $0x138] sm:$0xff]  ;;  %v473_v6 = vsub.f32 %v409_v54, %v441_v26  ;;  %v1564_v26 = vld [vmem:[%s1211_s22 + $0x160] sm:$0xff] }
  0x53   : > { %501 = vst [vmem:[%s1272_s18 + $0xe0] sm:$0xff] %v469_v20  ;;  %v471_v20 = vsub.f32 %v407_v48, %v439_v19  ;;  %v1525_v48 = vld [vmem:[#allocation5 + $0x98] sm:$0xff]  ;;  %v1528_v19 = vld [vmem:[%s1211_s22 + $0x140] sm:$0xff] }
  0x54   : > { %1957 = vst [vmem:[#allocation25_spill] sm:$0xff] %v1512_v21  ;;  %v442_v25 = vmul.f32 %v1525_v48, %v1515_v61  ;;  %v411_v27 = vmul.f32 %v1538_v16, %v1528_v19 }
  0x55   : > { %617 = vst [vmem:[%s1272_s18 + $0x30] sm:$0xff] %v585_v3  ;;  %v410_v3 = vmul.f32 %v1523_v29, %v1512_v21  ;;  %v1553_v21 = vld [vmem:[%s1211_s22 + $0x158] sm:$0xff] }
  0x56   : > { %502 = vst [vmem:[%s1272_s18 + $0xe8] sm:$0xff] %v470_v18  ;;  %v524_v18 = vmul.f32 %v1292_v35, %v1290_v34  ;;  %v556_v34 = vmul.f32 %v1294_v36, %v1282_v31  ;;  %v1573_v36 = vld [vmem:[#allocation2 + $0xb0] sm:$0xff] }
  0x57   : > { %1958 = vst [vmem:[#allocation26_spill] sm:$0xff] %v1523_v29  ;;  %v1555_v29 = vld [vmem:[#allocation2 + $0xa8] sm:$0xff]  ;;  %v474_v35 = vsub.f32 %v410_v3, %v442_v25  ;;  %v1575_v3 = vld [vmem:[#allocation5 + $0xb0] sm:$0xff] }
  0x58   : > { %1959 = vst [vmem:[#allocation27_spill] sm:$0xff] %v1525_v48  ;;  %v1550_v48 = vld [vmem:[%s1211_s22 + $0x148] sm:$0xff] }
  0x59   : > { %1960 = vst [vmem:[#allocation28_spill] sm:$0xff] %v1528_v19  ;;  %v412_v54 = vmul.f32 %v1555_v29, %v1550_v48  ;;  %v587_v19 = vadd.f32 %v555_v60, %v523_v0  ;;  %v1578_v25 = vld [vmem:[%s1211_s22 + $0x168] sm:$0xff]  ;;  %v1586_v0 = vld [vmem:[%s1211_s22 + $0x178] sm:$0xff] }
  0x5a   : > { %503 = vst [vmem:[%s1272_s18 + $0x100] sm:$0xff] %v471_v20  ;;  %v443_v20 = vmul.f32 %v1540_v38, %v1536_v30  ;;  %v1588_v60 = vld [vmem:[#allocation2 + $0xb8] sm:$0xff] }
  0x5b   : > { %1961 = vst [vmem:[#allocation29_spill] sm:$0xff] %v1538_v16 }
  0x5c   : > { %1962 = vst [vmem:[#allocation30_spill] sm:$0xff] %v1540_v38  ;;  %v1567_v38 = vld [vmem:[%s1211_s22 + $0x170] sm:$0xff]  ;;  %v475_v16 = vsub.f32 %v411_v27, %v443_v20  ;;  %v414_v20 = vmul.f32 %v1588_v60, %v1578_v25 }
  0x5d   : > { %504 = vst [vmem:[%s1272_s18 + $0x108] sm:$0xff] %v472_v23  ;;  %v1559_v23 = vld [vmem:[#allocation5 + $0xa8] sm:$0xff] }
  0x5e   : > { %1963 = vst [vmem:[#allocation31_spill] sm:$0xff] %v1550_v48  ;;  %v444_v31 = vmul.f32 %v1559_v23, %v1553_v21  ;;  %v413_v48 = vmul.f32 %v1573_v36, %v1564_v26 }
  0x5f   : > { %1964 = vst [vmem:[#allocation32_spill] sm:$0xff] %v1555_v29  ;;  %v1605_v29 = vld [vmem:[#allocation5 + $0xc0] sm:$0xff] }
  0x60   : > { %1965 = vst [vmem:[#allocation33_spill] sm:$0xff] %v1559_v23  ;;  %v476_v27 = vsub.f32 %v412_v54, %v444_v31  ;;  %v1610_v54 = vld [vmem:[%s1211_s22 + $0x188] sm:$0xff]  ;;  %v1613_v31 = vld [vmem:[%s1211_s22 + $0x198] sm:$0xff] }
  0x61   : > { %1966 = vst [vmem:[#allocation34_spill] sm:$0xff] %v1564_v26  ;;  %v1598_v26 = vld [vmem:[%s1211_s22 + $0x180] sm:$0xff] }
  0x62   : > { %1967 = vst [vmem:[#allocation35_spill] sm:$0xff] %v1567_v38 }
  0x63   : > { %618 = vst [vmem:[%s1272_s18 + $0x38] sm:$0xff] %v586_v5  ;;  %v445_v5 = vmul.f32 %v1575_v3, %v1567_v38  ;;  %v588_v38 = vadd.f32 %v556_v34, %v524_v18  ;;  %v1623_v34 = vld [vmem:[#allocation2 + $0xc8] sm:$0xff] }
  0x64   : > { %505 = vst [vmem:[%s1272_s18 + $0x120] sm:$0xff] %v473_v6  ;;  %v1590_v6 = vld [vmem:[#allocation5 + $0xb8] sm:$0xff] }
  0x65   : > { %1968 = vst [vmem:[#allocation36_spill] sm:$0xff] %v1573_v36  ;;  %v1603_v36 = vld [vmem:[#allocation2 + $0xc0] sm:$0xff]  ;;  %v477_v23 = vsub.f32 %v413_v48, %v445_v5  ;;  %v1625_v5 = vld [vmem:[#allocation5 + $0xc8] sm:$0xff] }
  0x66   : > { %1969 = vst [vmem:[#allocation37_spill] sm:$0xff] %v1575_v3  ;;  %v1601_v3 = vld [vmem:[%s1211_s22 + $0x190] sm:$0xff] }
  0x67   : > { %1970 = vst [vmem:[#allocation38_spill] sm:$0xff] %v1578_v25  ;;  %v557_v25 = vmul.f32 %v1309_v44, %v1302_v40  ;;  %v447_v18 = vmul.f32 %v1605_v29, %v1601_v3  ;;  %v448_v40 = vmul.f32 %v1625_v5, %v1613_v31  ;;  %v1638_v44 = vld [vmem:[#allocation2 + $0xd0] sm:$0xff] }
  0x68   : > { %506 = vst [vmem:[%s1272_s18 + $0x128] sm:$0xff] %v474_v35  ;;  %v446_v35 = vmul.f32 %v1590_v6, %v1586_v0 }
  0x69   : > { %1971 = vst [vmem:[#allocation39_spill] sm:$0xff] %v1590_v6  ;;  %v525_v6 = vmul.f32 %v1307_v42, %v1305_v41  ;;  %v416_v41 = vmul.f32 %v1623_v34, %v1610_v54  ;;  %v1636_v42 = vld [vmem:[%s1211_s22 + $0x1b0] sm:$0xff] }
  0x6a   : > { %507 = vst [vmem:[%s1272_s18 + $0x140] sm:$0xff] %v475_v16  ;;  %v415_v16 = vmul.f32 %v1603_v36, %v1598_v26  ;;  %v478_v48 = vsub.f32 %v414_v20, %v446_v35 }
  0x6b   : > { %1972 = vst [vmem:[#allocation40_spill] sm:$0xff] %v1598_v26  ;;  %v1628_v26 = vld [vmem:[%s1211_s22 + $0x1a0] sm:$0xff] }
  0x6c   : > { %1973 = vst [vmem:[#allocation41_spill] sm:$0xff] %v1610_v54  ;;  %v479_v20 = vsub.f32 %v415_v16, %v447_v18  ;;  %v417_v35 = vmul.f32 %v1638_v44, %v1628_v26  ;;  %v1652_v54 = vld [vmem:[%s1211_s22 + $0x1a8] sm:$0xff]  ;;  %v1667_v16 = vld [vmem:[%s1211_s22 + $0x1d0] sm:$0xff] }
  0x6d   : > { %1974 = vst [vmem:[#allocation42_spill] sm:$0xff] %v1613_v31  ;;  %v1657_v31 = vld [vmem:[#allocation2 + $0xd8] sm:$0xff] }
  0x6e   : > { %619 = vst [vmem:[%s1272_s18 + $0x50] sm:$0xff] %v587_v19  ;;  %v1640_v19 = vld [vmem:[#allocation5 + $0xd0] sm:$0xff] }
  0x6f   : > { %508 = vst [vmem:[%s1272_s18 + $0x148] sm:$0xff] %v476_v27  ;;  %v526_v27 = vmul.f32 %v1322_v50, %v1317_v47  ;;  %v480_v47 = vsub.f32 %v416_v41, %v448_v40  ;;  %v1659_v50 = vld [vmem:[#allocation5 + $0xd8] sm:$0xff]  ;;  %v1673_v41 = vld [vmem:[#allocation2 + $0xe0] sm:$0xff] }
  0x70   : > { %1975 = vst [vmem:[#allocation43_spill] sm:$0xff] %v1623_v34  ;;  %v1655_v34 = vld [vmem:[%s1211_s22 + $0x1b8] sm:$0xff]  ;;  %v1675_v40 = vld [vmem:[#allocation5 + $0xe0] sm:$0xff] }
  0x71   : > { %1976 = vst [vmem:[#allocation44_spill] sm:$0xff] %v1625_v5  ;;  %v449_v5 = vmul.f32 %v1640_v19, %v1636_v42 }
  0x72   : > { %1977 = vst [vmem:[#allocation45_spill] sm:$0xff] %v1628_v26  ;;  %v1678_v26 = vld [vmem:[%s1211_s22 + $0x1c8] sm:$0xff] }
  0x73   : > { %509 = vst [vmem:[%s1272_s18 + $0x160] sm:$0xff] %v477_v23  ;;  %v558_v23 = vmul.f32 %v1324_v51, %v1314_v46  ;;  %v418_v46 = vmul.f32 %v1657_v31, %v1652_v54  ;;  %v1664_v51 = vld [vmem:[%s1211_s22 + $0x1c0] sm:$0xff]  ;;  %v481_v18 = vsub.f32 %v417_v35, %v449_v5  ;;  %v1690_v5 = vld [vmem:[#allocation5 + $0xe8] sm:$0xff]  ;;  %v527_v35 = vmul.f32 %v1337_v56, %v1335_v55  ;;  %v1709_v56 = vld [vmem:[#allocation5 + $0xf0] sm:$0xff] }
  0x74   : > { %1978 = vst [vmem:[#allocation46_spill] sm:$0xff] %v1640_v19  ;;  %v450_v19 = vmul.f32 %v1659_v50, %v1655_v34 }
  0x75   : > { %510 = vst [vmem:[%s1272_s18 + $0x168] sm:$0xff] %v478_v48  ;;  %v589_v48 = vadd.f32 %v557_v25, %v525_v6  ;;  %v1686_v25 = vld [vmem:[%s1211_s22 + $0x1d8] sm:$0xff]  ;;  %v1688_v6 = vld [vmem:[#allocation2 + $0xe8] sm:$0xff] }
  0x76   : > { %1979 = vst [vmem:[#allocation47_spill] sm:$0xff] %v1652_v54  ;;  %v419_v54 = vmul.f32 %v1673_v41, %v1664_v51 }
  0x77   : > { %1980 = vst [vmem:[#allocation48_spill] sm:$0xff] %v1659_v50  ;;  %v1705_v50 = vld [vmem:[#allocation2 + $0xf0] sm:$0xff] }
  0x78   : > { %1981 = vst [vmem:[#allocation49_spill] sm:$0xff] %v1664_v51  ;;  %v420_v51 = vmul.f32 %v1688_v6, %v1678_v26 }
  0x79   : > { %1982 = vst [vmem:[#allocation50_spill] sm:$0xff] %v1667_v16 }
  0x7a   : > { %620 = vst [vmem:[%s1272_s18 + $0x58] sm:$0xff] %v588_v38  ;;  %v451_v38 = vmul.f32 %v1675_v40, %v1667_v16  ;;  %v1703_v16 = vld [vmem:[%s1211_s22 + $0x1f0] sm:$0xff] }
  0x7b   : > { %511 = vst [vmem:[%s1272_s18 + $0x180] sm:$0xff] %v479_v20  ;;  %v590_v20 = vadd.f32 %v558_v23, %v526_v27  ;;  %v559_v27 = vmul.f32 %v1339_v57, %v1327_v52  ;;  %v1714_v23 = vld [vmem:[%s1211_s22 + $0x1e8] sm:$0xff]  ;;  %v453_v57 = vmul.f32 %v1709_v56, %v1703_v16 }
  0x7c   : > { %1983 = vst [vmem:[#allocation51_spill] sm:$0xff] %v1673_v41  ;;  %v1700_v41 = vld [vmem:[%s1211_s22 + $0x1e0] sm:$0xff]  ;;  %v483_v55 = vsub.f32 %v419_v54, %v451_v38  ;;  %v1727_v54 = vld [vmem:[#allocation2 + $0xf8] sm:$0xff] }
  0x7d   : > { %1984 = vst [vmem:[#allocation52_spill] sm:$0xff] %v1675_v40  ;;  %v452_v40 = vmul.f32 %v1690_v5, %v1686_v25  ;;  %v1729_v38 = vld [vmem:[#allocation5 + $0xf8] sm:$0xff] }
  0x7e   : > { %512 = vst [vmem:[%s1272_s18 + $0x188] sm:$0xff] %v480_v47  ;;  %v482_v47 = vsub.f32 %v418_v46, %v450_v19  ;;  %v421_v19 = vmul.f32 %v1705_v50, %v1700_v41  ;;  %v1717_v46 = vld [vmem:[%s1211_s22 + $0x1f8] sm:$0xff] }
  0x7f   : > { %1985 = vst [vmem:[#allocation53_spill] sm:$0xff] %v1690_v5  ;;  %v560_v5 = vmul.f32 %v1358_v2, %v1349_v63  ;;  %v484_v52 = vsub.f32 %v420_v51, %v452_v40  ;;  %v422_v63 = vmul.f32 %v1727_v54, %v1714_v23  ;;  %v562_v2 = vmul.f32 %v1390_v32, %v1378_v24  ;;  %v1987_v32 = vld [vmem:[#allocation14_spill] sm:$0xff] }
  0x80   : > { %513 = vst [vmem:[%s1272_s18 + $0x1a0] sm:$0xff] %v481_v18  ;;  %v528_v18 = vmul.f32 %v1354_v7, %v1352_v4  ;;  %v454_v4 = vmul.f32 %v1729_v38, %v1717_v46  ;;  %v530_v7 = vmul.f32 %v1388_v28, %v1386_v9  ;;  %v532_v9 = vmul.f32 %v1423_v62, %v1415_v59  ;;  %v1991_v62 = vld [vmem:[#allocation18_spill] sm:$0xff] }
  0x81   : > { %1986 = vst [vmem:[#allocation54_spill] sm:$0xff] %v1700_v41  ;;  %v529_v41 = vmul.f32 %v1373_v8, %v1366_v12  ;;  %v485_v12 = vsub.f32 %v421_v19, %v453_v57  ;;  %v591_v8 = vadd.f32 %v559_v27, %v527_v35  ;;  %v564_v24 = vmul.f32 %v1425_v1, %v1412_v58  ;;  %v1992_v1 = vld [vmem:[#allocation19_spill] sm:$0xff]  ;;  %v1995_v19 = vld [vmem:[#allocation22_spill] sm:$0xff]  ;;  %v1997_v57 = vld [vmem:[#allocation21_spill] sm:$0xff] }
  0x82   : > { %621 = vst [vmem:[%s1272_s18 + $0x70] sm:$0xff] %v589_v48  ;;  %v561_v48 = vmul.f32 %v1375_v22, %v1363_v11  ;;  %v531_v11 = vmul.f32 %v1403_v45, %v1401_v43  ;;  %v563_v22 = vmul.f32 %v1407_v53, %v1398_v39  ;;  %v486_v51 = vsub.f32 %v422_v63, %v454_v4  ;;  %v1988_v43 = vld [vmem:[#allocation13_spill] sm:$0xff]  ;;  %v1989_v45 = vld [vmem:[#allocation15_spill] sm:$0xff] }
  0x83   : > { %514 = vst [vmem:[%s1272_s18 + $0x1a8] sm:$0xff] %v482_v47  ;;  %v592_v40 = vadd.f32 %v560_v5, %v528_v18  ;;  %v533_v35 = vmul.f32 %v1987_v32, %v1436_v15  ;;  %v565_v47 = vmul.f32 %v1989_v45, %v1988_v43  ;;  %v594_v39 = vadd.f32 %v562_v2, %v530_v7  ;;  %v1990_v5 = vld [vmem:[#allocation16_spill] sm:$0xff]  ;;  %v1996_v18 = vld [vmem:[#allocation23_spill] sm:$0xff]  ;;  %v1999_v7 = vld [vmem:[#allocation26_spill] sm:$0xff] }
  0x84   : > { %515 = vst [vmem:[%s1272_s18 + $0x1c0] sm:$0xff] %v483_v55  ;;  %v593_v28 = vadd.f32 %v561_v48, %v529_v41  ;;  %v534_v53 = vmul.f32 %v1453_v37, %v1451_v33  ;;  %v566_v59 = vmul.f32 %v1457_v13, %v1990_v5  ;;  %v595_v58 = vadd.f32 %v563_v22, %v531_v11  ;;  %v1994_v15 = vld [vmem:[#allocation20_spill] sm:$0xff]  ;;  %v2008_v43 = vld [vmem:[#allocation35_spill] sm:$0xff] }
  0x85   : > { %516 = vst [vmem:[%s1272_s18 + $0x1c8] sm:$0xff] %v484_v52  ;;  %v535_v41 = vmul.f32 %v1992_v1, %v1991_v62  ;;  %v596_v55 = vadd.f32 %v564_v24, %v532_v9  ;;  %v536_v52 = vmul.f32 %v1996_v18, %v1995_v19  ;;  %v1998_v33 = vld [vmem:[#allocation24_spill] sm:$0xff]  ;;  %v597_v13 = vadd.f32 %v565_v47, %v533_v35  ;;  %v2016_v19 = vld [vmem:[#allocation43_spill] sm:$0xff] }
  0x86   : > { %622 = vst [vmem:[%s1272_s18 + $0x78] sm:$0xff] %v590_v20  ;;  %v1993_v20 = vld [vmem:[#allocation17_spill] sm:$0xff]  ;;  %v568_v37 = vmul.f32 %v1998_v33, %v1997_v57  ;;  %v537_v48 = vmul.f32 %v1503_v14, %v1501_v10  ;;  %v569_v63 = vmul.f32 %v1507_v17, %v1498_v49  ;;  %v598_v4 = vadd.f32 %v566_v59, %v534_v53  ;;  %v2003_v9 = vld [vmem:[#allocation28_spill] sm:$0xff]  ;;  %v2004_v14 = vld [vmem:[#allocation30_spill] sm:$0xff] }
  0x87   : > { %517 = vst [vmem:[%s1272_s18 + $0x1e0] sm:$0xff] %v485_v12  ;;  %v567_v27 = vmul.f32 %v1994_v15, %v1993_v20  ;;  %v538_v2 = vmul.f32 %v1999_v7, %v1515_v61  ;;  %v2000_v12 = vld [vmem:[#allocation25_spill] sm:$0xff]  ;;  %v571_v10 = vmul.f32 %v2004_v14, %v2003_v9  ;;  %v2005_v49 = vld [vmem:[#allocation32_spill] sm:$0xff]  ;;  %v542_v59 = vmul.f32 %v1588_v60, %v1586_v0 }
  0x88   : > { %518 = vst [vmem:[%s1272_s18 + $0x1e8] sm:$0xff] %v486_v51  ;;  %v2002_v51 = vld [vmem:[#allocation29_spill] sm:$0xff]  ;;  %v600_v17 = vadd.f32 %v568_v37, %v536_v52  ;;  %v540_v24 = vmul.f32 %v2005_v49, %v1553_v21  ;;  %v601_v35 = vadd.f32 %v569_v63, %v537_v48  ;;  %v2009_v45 = vld [vmem:[#allocation36_spill] sm:$0xff]  ;;  %v2013_v21 = vld [vmem:[#allocation39_spill] sm:$0xff]  ;;  %v545_v33 = vmul.f32 %v1638_v44, %v1636_v42 }
  0x89   : > { %623 = vst [vmem:[%s1272_s18 + $0x90] sm:$0xff] %v591_v8  ;;  %v2001_v8 = vld [vmem:[#allocation27_spill] sm:$0xff]  ;;  %v599_v22 = vadd.f32 %v567_v27, %v535_v41  ;;  %v2007_v61 = vld [vmem:[#allocation33_spill] sm:$0xff]  ;;  %v541_v47 = vmul.f32 %v2009_v45, %v2008_v43  ;;  %v543_v41 = vmul.f32 %v1603_v36, %v1601_v3  ;;  %v2014_v20 = vld [vmem:[#allocation40_spill] sm:$0xff]  ;;  %v549_v9 = vmul.f32 %v1705_v50, %v1703_v16 }
  0x8a   : > { %624 = vst [vmem:[%s1272_s18 + $0x98] sm:$0xff] %v592_v40  ;;  %v570_v11 = vmul.f32 %v2001_v8, %v2000_v12  ;;  %v539_v40 = vmul.f32 %v2002_v51, %v1536_v30  ;;  %v2011_v30 = vld [vmem:[#allocation37_spill] sm:$0xff]  ;;  %v575_v15 = vmul.f32 %v1605_v29, %v2014_v20  ;;  %v2018_v60 = vld [vmem:[#allocation44_spill] sm:$0xff]  ;;  %v2020_v3 = vld [vmem:[#allocation46_spill] sm:$0xff] }
  0x8b   : > { %625 = vst [vmem:[%s1272_s18 + $0xb0] sm:$0xff] %v593_v28  ;;  %v2006_v28 = vld [vmem:[#allocation31_spill] sm:$0xff]  ;;  %v2017_v0 = vld [vmem:[#allocation41_spill] sm:$0xff]  ;;  %v2022_v63 = vld [vmem:[#allocation48_spill] sm:$0xff] }
  0x8c   : > { %626 = vst [vmem:[%s1272_s18 + $0xb8] sm:$0xff] %v594_v39  ;;  %v572_v32 = vmul.f32 %v2007_v61, %v2006_v28  ;;  %v2010_v39 = vld [vmem:[#allocation34_spill] sm:$0xff]  ;;  %v602_v5 = vadd.f32 %v570_v11, %v538_v2  ;;  %v603_v1 = vadd.f32 %v571_v10, %v539_v40  ;;  %v576_v52 = vmul.f32 %v2018_v60, %v2017_v0  ;;  %v2019_v36 = vld [vmem:[#allocation45_spill] sm:$0xff]  ;;  %v2021_v48 = vld [vmem:[#allocation47_spill] sm:$0xff] }
  0x8d   : > { %627 = vst [vmem:[%s1272_s18 + $0xd0] sm:$0xff] %v595_v58  ;;  %v573_v53 = vmul.f32 %v2011_v30, %v2010_v39  ;;  %v2012_v58 = vld [vmem:[#allocation38_spill] sm:$0xff]  ;;  %v577_v37 = vmul.f32 %v2020_v3, %v2019_v36  ;;  %v607_v7 = vadd.f32 %v575_v15, %v543_v41  ;;  %v2024_v12 = vld [vmem:[#allocation51_spill] sm:$0xff]  ;;  %v2025_v11 = vld [vmem:[#allocation49_spill] sm:$0xff] }
  0x8e   : > { %628 = vst [vmem:[%s1272_s18 + $0xd8] sm:$0xff] %v596_v55  ;;  %v574_v62 = vmul.f32 %v2013_v21, %v2012_v58  ;;  %v604_v27 = vadd.f32 %v572_v32, %v540_v24  ;;  %v2015_v55 = vld [vmem:[#allocation42_spill] sm:$0xff] }
  0x8f   : > { %629 = vst [vmem:[%s1272_s18 + $0xf0] sm:$0xff] %v597_v13  ;;  %v544_v18 = vmul.f32 %v2016_v19, %v2015_v55  ;;  %v605_v57 = vadd.f32 %v573_v53, %v541_v47  ;;  %v546_v13 = vmul.f32 %v1657_v31, %v1655_v34  ;;  %v2023_v2 = vld [vmem:[#allocation50_spill] sm:$0xff]  ;;  %v548_v31 = vmul.f32 %v1688_v6, %v1686_v25  ;;  %v2027_v34 = vld [vmem:[#allocation53_spill] sm:$0xff] }
  0x90   : > { %630 = vst [vmem:[%s1272_s18 + $0xf8] sm:$0xff] %v598_v4  ;;  %v606_v29 = vadd.f32 %v574_v62, %v542_v59  ;;  %v578_v4 = vmul.f32 %v2022_v63, %v2021_v48  ;;  %v547_v8 = vmul.f32 %v2024_v12, %v2023_v2  ;;  %v580_v51 = vmul.f32 %v2027_v34, %v1678_v26  ;;  %v2028_v14 = vld [vmem:[#allocation54_spill] sm:$0xff] }
  0x91   : > { %631 = vst [vmem:[%s1272_s18 + $0x110] sm:$0xff] %v599_v22  ;;  %v2026_v22 = vld [vmem:[#allocation52_spill] sm:$0xff]  ;;  %v608_v44 = vadd.f32 %v576_v52, %v544_v18  ;;  %v609_v40 = vadd.f32 %v577_v37, %v545_v33  ;;  %v581_v10 = vmul.f32 %v1709_v56, %v2028_v14  ;;  %v550_v25 = vmul.f32 %v1727_v54, %v1717_v46 }
  0x92   : > { %632 = vst [vmem:[%s1272_s18 + $0x118] sm:$0xff] %v600_v17  ;;  %v579_v42 = vmul.f32 %v2026_v22, %v2025_v11  ;;  %v610_v17 = vadd.f32 %v578_v4, %v546_v13  ;;  %v582_v6 = vmul.f32 %v1729_v38, %v1714_v23  ;;  %v612_v50 = vadd.f32 %v580_v51, %v548_v31 }
  0x93   : > { %633 = vst [vmem:[%s1272_s18 + $0x130] sm:$0xff] %v601_v35  ;;  %v613_v16 = vadd.f32 %v581_v10, %v549_v9 }
  0x94   : > { %634 = vst [vmem:[%s1272_s18 + $0x138] sm:$0xff] %v602_v5  ;;  %v611_v26 = vadd.f32 %v579_v42, %v547_v8  ;;  %v614_v56 = vadd.f32 %v582_v6, %v550_v25 }
  0x95   : > { %635 = vst [vmem:[%s1272_s18 + $0x150] sm:$0xff] %v603_v1 }
  0x96   : > { %636 = vst [vmem:[%s1272_s18 + $0x158] sm:$0xff] %v604_v27 }
  0x97   : > { %637 = vst [vmem:[%s1272_s18 + $0x170] sm:$0xff] %v605_v57 }
  0x98   : > { %638 = vst [vmem:[%s1272_s18 + $0x178] sm:$0xff] %v606_v29 }
  0x99   : > { %639 = vst [vmem:[%s1272_s18 + $0x190] sm:$0xff] %v607_v7 }
  0x9a   : > { %640 = vst [vmem:[%s1272_s18 + $0x198] sm:$0xff] %v608_v44 }
  0x9b   : > { %641 = vst [vmem:[%s1272_s18 + $0x1b0] sm:$0xff] %v609_v40 }
  0x9c   : > { %642 = vst [vmem:[%s1272_s18 + $0x1b8] sm:$0xff] %v610_v17 }
  0x9d   : > { %643 = vst [vmem:[%s1272_s18 + $0x1d0] sm:$0xff] %v611_v26 }
  0x9e   : > { %644 = vst [vmem:[%s1272_s18 + $0x1d8] sm:$0xff] %v612_v50 }
  0x9f   : > { %645 = vst [vmem:[%s1272_s18 + $0x1f0] sm:$0xff] %v613_v16 }
  0xa0   : > { %646 = vst [vmem:[%s1272_s18 + $0x1f8] sm:$0xff] %v614_v56 }
  0xa1   : > { %1003 = shalt.err (!%p1000_p0)
}
  0xa2   : > { %s1074_s9 = smov 512   ;;  %s1075_s25 = smov 32  }
  0xa3   : > { %807 = dma.vmem_to_hbm [thread:$0]  (%p1175_p7), %s664_s27, 8192, %s666_s28, %s648_s29, %s1074_s9, %s1074_s9, %s1075_s25  }
  0xa4 PF: > { %s680_s10 = sand.u32 1, %s1046_s12   ;;  %p821_p3 = pnand %p781_p11, %p1141_p6 }
  0xa5   : > { %s681_s22 = scalar_lea.sflag [#allocation4], %s680_s10 }
  0xa6   : > { %p822_p5 = pneg %p821_p3 }
  0xa8   : > { %1041 = dma.done.wait (%p822_p5), %s681_s22, 8192  }
  0xa9   : > { %1043 = vsyncadd (%p822_p5), %s681_s22, 4294959104  ;;  %s18_s17 = sadd.s32 1, %s1066_s17   ;;  %s2029_s12 = smov %s1050_s13 }
  0xaa   : > { %p15_p9 = scmp.ge.s32.totalorder %s18_s17, 4   ;;  %s2030_s13 = smov %s1054_s14 }
  0xab   : > { %s2031_s14 = smov %s1185_s26  ;;  %s2032_s15 = smov %s1062_s16 }
  0xac   : > { %s2033_s16 = smov %s2035_s8  ;;  %17 = sbr.rel (!%p15_p9) target bundleno = 8 (0x8), region = 86 }
  0xb1   :  { %687 = vsyncpa [#allocation3], 1 }
  0xb2   :  { %689 = vsyncpa [#allocation3 + $0x1], 1 }
  0xb3   :  { %690 = vsyncpa [#allocation6], 1 }
  0xb4   :  { %691 = vsyncpa [#allocation4], 1 }
  0xb5   :  { %693 = vsyncpa [#allocation4 + $0x1], 1 }

</bundles_post_ra>
